<compile_context>
chip_gen: v7x
topology: tpu7x:2x2x1
jax: 0.10.0
libtpu: 0.0.40
codegen_flags: <defaults>
</compile_context>

<pallas_src>
import functools

import jax
import jax.numpy as jnp
from jax import lax
from jax.experimental import pallas as pl
from jax.experimental.pallas import tpu as pltpu

DIM = 32          # `dim` of the module
GLBL = 108        # module hard-codes Linear(dim + 108, dim) for layer 0
ACT = "relu"      # chosen value for the `act` argument (getattr(F, act))

_VMEM_LIMIT = 32 * 1024 * 1024


def _round_up(a, b):
    return ((a + b - 1) // b) * b


# --------------------------------------------------------------------------
# Kernel 1: fused 3-layer MLP producing lane-dense logits^T [1, N_tile]
# --------------------------------------------------------------------------
def mlp_logits_kernel(x_ref, g_ref, w0x_ref, w0g_ref, b0_ref,
                      w1_ref, b1_ref, w2_ref, b2_ref, logits_ref):
    # bf16 HBM streams -> f32 vregs (f32 x f32 MXU matmul; works everywhere)
    x = x_ref[...].astype(jnp.float32)                          # [DIM,  T]
    g = g_ref[...].astype(jnp.float32)                          # [GLBL, T]

    # layer 0: (cat([x, glbl_x]) @ W0)^T == W0x^T @ x^T + W0g^T @ g^T
    h = (jnp.dot(w0x_ref[...], x, preferred_element_type=jnp.float32)
         + jnp.dot(w0g_ref[...], g, preferred_element_type=jnp.float32))
    h = jnp.maximum(h + b0_ref[...], 0.0)                       # act = relu

    # layer 1: Linear(dim, dim), act
    h = jnp.dot(w1_ref[...], h, preferred_element_type=jnp.float32)
    h = jnp.maximum(h + b1_ref[...], 0.0)

    # layer 2: Linear(dim, 1) as VPU broadcast-mul + sublane reduce
    # (avoids a 1-wide MXU result; output stays lane-dense [1, tile]).
    logits_ref[...] = (jnp.sum(w2_ref[...] * h, axis=0, keepdims=True)
                       + b2_ref[...])


# --------------------------------------------------------------------------
# Kernel 2: tiled two-phase segment softmax over graphs (tg_softmax)
#   grid = (phase, node_tile); phase 0 = online per-graph max / sum-exp,
#   phase 1 = normalize.  Per-graph stats live in a small VMEM scratch.
# --------------------------------------------------------------------------
def segment_softmax_kernel(logit_ref, bids_ref, out_ref, m_acc, l_acc):
    phase = pl.program_id(0)
    tile = pl.program_id(1)
    g_pad = m_acc.shape[0]
    t = logit_ref.shape[1]

    @pl.when(jnp.logical_and(phase == 0, tile == 0))
    def _init():
        m_acc[...] = jnp.full_like(m_acc, -1e30)
        l_acc[...] = jnp.zeros_like(l_acc)

    # per-tile membership, built in-register (no O(N*G) HBM traffic);
    # padded nodes carry batch id -1 and never match any graph row.
    gid = lax.broadcasted_iota(jnp.int32, (g_pad, t), 0)
    onehot = bids_ref[...] == gid                       # [G_pad, T]
    logit = logit_ref[...]                              # [1, T] f32

    @pl.when(phase == 0)
    def _accumulate():
        masked = jnp.where(onehot, logit, -1e30)                       # [G_pad, T]
        tile_max = jnp.max(masked, axis=1, keepdims=True)              # [G_pad, 1]
        m_old = m_acc[...]
        m_new = jnp.maximum(m_old, tile_max)
        p = jnp.where(onehot, jnp.exp(masked - m_new), 0.0)            # [G_pad, T]
        l_acc[...] = (l_acc[...] * jnp.exp(m_old - m_new)
                      + jnp.sum(p, axis=1, keepdims=True))
        m_acc[...] = m_new
        out_ref[...] = jnp.zeros_like(out_ref)          # keep block defined

    @pl.when(phase == 1)
    def _normalize():
        of = onehot.astype(jnp.float32)
        node_max = jnp.sum(of * m_acc[...], axis=0, keepdims=True)     # [1, T]
        node_l = jnp.sum(of * l_acc[...], axis=0, keepdims=True)       # [1, T]
        e = jnp.exp(logit - node_max)
        out_ref[...] = e / (node_l + 1e-16)


# --------------------------------------------------------------------------
# Wrapper
# --------------------------------------------------------------------------
@functools.partial(jax.jit, static_argnames=("num_graphs", "tile_n"))
def egat_att_forward(x, glbl_x, batch, params, num_graphs, *, tile_n=2048):
    """x: [N, DIM] f32, glbl_x: [N, GLBL] f32, batch: [N] i32."""
    n = x.shape[0]
    w0, b0, w1, b1, w2, b2 = params

    # node-tile choice: lane-dense tiles, sized well under the VMEM budget
    tn = min(tile_n, _round_up(n, 128))
    npad = _round_up(n, tn)
    num_tiles = npad // tn
    g_pad = max(8, _round_up(num_graphs, 8))

    # layout plumbing: nodes -> lanes, features -> sublanes.
    # Large node-feature streams stored bf16 (halves HBM traffic); weights f32.
    xT = jnp.zeros((DIM, npad), jnp.bfloat16).at[:, :n].set(
        x.T.astype(jnp.bfloat16))
    gT = jnp.zeros((GLBL, npad), jnp.bfloat16).at[:, :n].set(
        glbl_x.T.astype(jnp.bfloat16))
    bids = jnp.full((1, npad), -1, jnp.int32).at[0, :n].set(
        batch.astype(jnp.int32))

    w0xT = w0[:DIM].T.astype(jnp.float32)         # [DIM, DIM]
    w0gT = w0[DIM:].T.astype(jnp.float32)         # [DIM, GLBL]
    w1T = w1.T.astype(jnp.float32)                # [DIM, DIM]
    b0c = b0[:, None].astype(jnp.float32)         # [DIM, 1]
    b1c = b1[:, None].astype(jnp.float32)         # [DIM, 1]
    w2c = w2.astype(jnp.float32)                  # [DIM, 1]
    b2c = b2.reshape(1, 1).astype(jnp.float32)    # [1, 1]

    # ---- pass 1: fused MLP -> lane-dense logits^T [1, npad] ----------------
    resident = lambda i: (0, 0)
    logitsT = pl.pallas_call(
        mlp_logits_kernel,
        out_shape=jax.ShapeDtypeStruct((1, npad), jnp.float32),
        grid=(num_tiles,),
        in_specs=[
            pl.BlockSpec((DIM, tn), lambda i: (0, i)),     # x^T tile
            pl.BlockSpec((GLBL, tn), lambda i: (0, i)),    # glbl_x^T tile
            pl.BlockSpec((DIM, DIM), resident),            # W0x^T
            pl.BlockSpec((DIM, GLBL), resident),           # W0g^T
            pl.BlockSpec((DIM, 1), resident),              # b0
            pl.BlockSpec((DIM, DIM), resident),            # W1^T
            pl.BlockSpec((DIM, 1), resident),              # b1
            pl.BlockSpec((DIM, 1), resident),              # w2 (column)
            pl.BlockSpec((1, 1), resident),                # b2
        ],
        out_specs=pl.BlockSpec((1, tn), lambda i: (0, i)),
        compiler_params=pltpu.CompilerParams(
            dimension_semantics=("parallel",),
            vmem_limit_bytes=_VMEM_LIMIT),
    )(xT, gT, w0xT, w0gT, b0c, w1T, b1c, w2c, b2c)

    # ---- pass 2: tiled two-phase segment softmax ---------------------------
    out_pad = pl.pallas_call(
        segment_softmax_kernel,
        out_shape=jax.ShapeDtypeStruct((1, npad), jnp.float32),
        grid=(2, num_tiles),
        in_specs=[
            pl.BlockSpec((1, tn), lambda p, i: (0, i)),    # logits tile
            pl.BlockSpec((1, tn), lambda p, i: (0, i)),    # batch ids tile
        ],
        out_specs=pl.BlockSpec((1, tn), lambda p, i: (0, i)),
        scratch_shapes=[
            pltpu.VMEM((g_pad, 1), jnp.float32),           # per-graph running max
            pltpu.VMEM((g_pad, 1), jnp.float32),           # per-graph running sum-exp
        ],
        compiler_params=pltpu.CompilerParams(
            dimension_semantics=("arbitrary", "arbitrary"),
            vmem_limit_bytes=_VMEM_LIMIT),
    )(logitsT, bids)

    return out_pad[0, :n][:, None]                         # back to [N, 1]


def init_params(key, dim=DIM, glbl=GLBL):
    """Deterministic Linear-style init: U(-1/sqrt(fan_in), 1/sqrt(fan_in))."""
    def linear(k, fan_in, fan_out):
        kw, kb = jax.random.split(k)
        bound = 1.0 / jnp.sqrt(fan_in)
        w = jax.random.uniform(kw, (fan_in, fan_out), jnp.float32, -bound, bound)
        b = jax.random.uniform(kb, (fan_out,), jnp.float32, -bound, bound)
        return w, b
    k0, k1, k2 = jax.random.split(key, 3)
    w0, b0 = linear(k0, dim + glbl, dim)   # Linear(dim + 108, dim)
    w1, b1 = linear(k1, dim, dim)          # Linear(dim, dim)
    w2, b2 = linear(k2, dim, 1)            # Linear(dim, 1)
    return (w0, b0, w1, b1, w2, b2)


def reference_forward(x, glbl_x, batch, params, num_graphs):
    """Pure-JAX (f32) reference of the same forward (correctness check)."""
    w0, b0, w1, b1, w2, b2 = params
    out = jnp.concatenate([x, glbl_x], axis=-1)
    out = jnp.maximum(out @ w0 + b0, 0.0)
    out = jnp.maximum(out @ w1 + b1, 0.0)
    out = out @ w2 + b2                                     # [N, 1]
    seg_max = jax.ops.segment_max(out, batch, num_segments=num_graphs)
    out = jnp.exp(out - seg_max[batch])
    seg_sum = jax.ops.segment_sum(out, batch, num_segments=num_graphs)
    return out / (seg_sum[batch] + 1e-16)


if __name__ == "__main__":
    key = jax.random.PRNGKey(0)
    kx, kg, kp = jax.random.split(key, 3)

    N = 16                      # total nodes across the batch
    NUM_GRAPHS = 2
    batch = jnp.array([0] * 8 + [1] * 8, dtype=jnp.int32)   # sorted graph ids
    x = jax.random.normal(kx, (N, DIM), jnp.float32)
    glbl_x = jax.random.normal(kg, (N, GLBL), jnp.float32)
    params = init_params(kp)

    out = egat_att_forward(x, glbl_x, batch, params, NUM_GRAPHS)
    out = jax.block_until_ready(out)

    ref = reference_forward(x, glbl_x, batch, params, NUM_GRAPHS)
    assert out.shape == (N, 1)
    err = float(jnp.max(jnp.abs(out - ref)))
    # bf16-quantized node/global feature streams vs f32 reference
    assert err < 1e-2, f"max abs err {err}"

    print("KERNEL_OK")
</pallas_src>

<mosaic_0001>
module attributes {stable_mosaic.version = 11 : i64} {
  func.func @mlp_logits_kernel(%arg0: i32, %arg1: memref<32x128xbf16, #tpu.memory_space<vmem>>, %arg2: memref<108x128xbf16, #tpu.memory_space<vmem>>, %arg3: memref<32x32xf32, #tpu.memory_space<vmem>>, %arg4: memref<32x108xf32, #tpu.memory_space<vmem>>, %arg5: memref<32x1xf32, #tpu.memory_space<vmem>>, %arg6: memref<32x32xf32, #tpu.memory_space<vmem>>, %arg7: memref<32x1xf32, #tpu.memory_space<vmem>>, %arg8: memref<32x1xf32, #tpu.memory_space<vmem>>, %arg9: memref<1x1xf32, #tpu.memory_space<vmem>>, %arg10: memref<1x128xf32, #tpu.memory_space<vmem>>) attributes {dimension_semantics = [#tpu.dimension_semantics<parallel>], iteration_bounds = array<i64: 1>, scalar_prefetch = 0 : i64, scratch_operands = 0 : i64, tpu.core_type = #tpu.core_type<tc>, window_params = [{transform_indices = @transform_0, window_bounds = array<i64: 32, 128>}, {transform_indices = @transform_1, window_bounds = array<i64: 108, 128>}, {pipeline_mode = #tpu.pipeline_mode<synchronous>, transform_indices = @transform_2, window_bounds = array<i64: 32, 32>}, {pipeline_mode = #tpu.pipeline_mode<synchronous>, transform_indices = @transform_3, window_bounds = array<i64: 32, 108>}, {pipeline_mode = #tpu.pipeline_mode<synchronous>, transform_indices = @transform_4, window_bounds = array<i64: 32, 1>}, {pipeline_mode = #tpu.pipeline_mode<synchronous>, transform_indices = @transform_5, window_bounds = array<i64: 32, 32>}, {pipeline_mode = #tpu.pipeline_mode<synchronous>, transform_indices = @transform_6, window_bounds = array<i64: 32, 1>}, {pipeline_mode = #tpu.pipeline_mode<synchronous>, transform_indices = @transform_7, window_bounds = array<i64: 32, 1>}, {pipeline_mode = #tpu.pipeline_mode<synchronous>, transform_indices = @transform_8, window_bounds = array<i64: 1, 1>}, {transform_indices = @transform_9, window_bounds = array<i64: 1, 128>}]} {
    %c0 = arith.constant 0 : index
    %c0_0 = arith.constant 0 : index
    %0 = vector.load %arg1[%c0, %c0_0] : memref<32x128xbf16, #tpu.memory_space<vmem>>, vector<32x128xbf16>
    %1 = arith.extf %0 : vector<32x128xbf16> to vector<32x128xf32>
    %c0_1 = arith.constant 0 : index
    %c0_2 = arith.constant 0 : index
    %2 = vector.load %arg2[%c0_1, %c0_2] : memref<108x128xbf16, #tpu.memory_space<vmem>>, vector<108x128xbf16>
    %3 = arith.extf %2 : vector<108x128xbf16> to vector<108x128xf32>
    %c0_3 = arith.constant 0 : index
    %c0_4 = arith.constant 0 : index
    %4 = vector.load %arg3[%c0_3, %c0_4] : memref<32x32xf32, #tpu.memory_space<vmem>>, vector<32x32xf32>
    %cst = arith.constant dense<0.000000e+00> : vector<32x128xf32>
    %5 = tpu.matmul %4, %1, %cst {dimension_numbers = #tpu.dot_dimension_numbers<[1], [0], [0], [1], [0, 0, 1, 1], [], []>} : vector<32x32xf32>, vector<32x128xf32>, vector<32x128xf32> -> vector<32x128xf32>
    %c0_5 = arith.constant 0 : index
    %c0_6 = arith.constant 0 : index
    %6 = vector.load %arg4[%c0_5, %c0_6] : memref<32x108xf32, #tpu.memory_space<vmem>>, vector<32x108xf32>
    %cst_7 = arith.constant dense<0.000000e+00> : vector<32x128xf32>
    %7 = tpu.matmul %6, %3, %cst_7 {dimension_numbers = #tpu.dot_dimension_numbers<[1], [0], [0], [1], [0, 0, 1, 1], [], []>} : vector<32x108xf32>, vector<108x128xf32>, vector<32x128xf32> -> vector<32x128xf32>
    %8 = arith.addf %5, %7 : vector<32x128xf32>
    %c0_8 = arith.constant 0 : index
    %c0_9 = arith.constant 0 : index
    %9 = vector.load %arg5[%c0_8, %c0_9] : memref<32x1xf32, #tpu.memory_space<vmem>>, vector<32x1xf32>
    %10 = vector.broadcast %9 : vector<32x1xf32> to vector<32x128xf32>
    %11 = arith.addf %8, %10 : vector<32x128xf32>
    %cst_10 = arith.constant 0.000000e+00 : f32
    %12 = vector.broadcast %cst_10 : f32 to vector<32x128xf32>
    %13 = arith.maximumf %11, %12 : vector<32x128xf32>
    %c0_11 = arith.constant 0 : index
    %c0_12 = arith.constant 0 : index
    %14 = vector.load %arg6[%c0_11, %c0_12] : memref<32x32xf32, #tpu.memory_space<vmem>>, vector<32x32xf32>
    %cst_13 = arith.constant dense<0.000000e+00> : vector<32x128xf32>
    %15 = tpu.matmul %14, %13, %cst_13 {dimension_numbers = #tpu.dot_dimension_numbers<[1], [0], [0], [1], [0, 0, 1, 1], [], []>} : vector<32x32xf32>, vector<32x128xf32>, vector<32x128xf32> -> vector<32x128xf32>
    %c0_14 = arith.constant 0 : index
    %c0_15 = arith.constant 0 : index
    %16 = vector.load %arg7[%c0_14, %c0_15] : memref<32x1xf32, #tpu.memory_space<vmem>>, vector<32x1xf32>
    %17 = vector.broadcast %16 : vector<32x1xf32> to vector<32x128xf32>
    %18 = arith.addf %15, %17 : vector<32x128xf32>
    %cst_16 = arith.constant 0.000000e+00 : f32
    %19 = vector.broadcast %cst_16 : f32 to vector<32x128xf32>
    %20 = arith.maximumf %18, %19 : vector<32x128xf32>
    %c0_17 = arith.constant 0 : index
    %c0_18 = arith.constant 0 : index
    %21 = vector.load %arg8[%c0_17, %c0_18] : memref<32x1xf32, #tpu.memory_space<vmem>>, vector<32x1xf32>
    %22 = vector.broadcast %21 : vector<32x1xf32> to vector<32x128xf32>
    %23 = arith.mulf %22, %20 : vector<32x128xf32>
    %cst_19 = arith.constant dense<0.000000e+00> : vector<128xf32>
    %24 = vector.multi_reduction <add>, %23, %cst_19 [0] : vector<32x128xf32> to vector<128xf32>
    %25 = vector.shape_cast %24 : vector<128xf32> to vector<1x128xf32>
    %c0_20 = arith.constant 0 : index
    %c0_21 = arith.constant 0 : index
    %26 = vector.load %arg9[%c0_20, %c0_21] : memref<1x1xf32, #tpu.memory_space<vmem>>, vector<1x1xf32>
    %27 = vector.broadcast %26 : vector<1x1xf32> to vector<1x128xf32>
    %28 = arith.addf %25, %27 : vector<1x128xf32>
    %c0_22 = arith.constant 0 : index
    %c0_23 = arith.constant 0 : index
    %29 = vector.load %arg10[%c0_22, %c0_23] : memref<1x128xf32, #tpu.memory_space<vmem>>, vector<1x128xf32>
    tpu.vector_store %arg10[%c0_22, %c0_23], %28 {strides = array<i32>} : memref<1x128xf32, #tpu.memory_space<vmem>>, vector<1x128xf32>,
    return
  }
  func.func @transform_0(%arg0: i32) -> (i32, i32) {
    %c0_i32 = arith.constant 0 : i32
    %c0_i32_0 = arith.constant 0 : i32
    return %c0_i32, %arg0 : i32, i32
  }
  func.func @transform_1(%arg0: i32) -> (i32, i32) {
    %c0_i32 = arith.constant 0 : i32
    %c0_i32_0 = arith.constant 0 : i32
    return %c0_i32, %arg0 : i32, i32
  }
  func.func @transform_2(%arg0: i32) -> (i32, i32) {
    %c0_i32 = arith.constant 0 : i32
    %c0_i32_0 = arith.constant 0 : i32
    %c0_i32_1 = arith.constant 0 : i32
    return %c0_i32, %c0_i32_0 : i32, i32
  }
  func.func @transform_3(%arg0: i32) -> (i32, i32) {
    %c0_i32 = arith.constant 0 : i32
    %c0_i32_0 = arith.constant 0 : i32
    %c0_i32_1 = arith.constant 0 : i32
    return %c0_i32, %c0_i32_0 : i32, i32
  }
  func.func @transform_4(%arg0: i32) -> (i32, i32) {
    %c0_i32 = arith.constant 0 : i32
    %c0_i32_0 = arith.constant 0 : i32
    %c0_i32_1 = arith.constant 0 : i32
    return %c0_i32, %c0_i32_0 : i32, i32
  }
  func.func @transform_5(%arg0: i32) -> (i32, i32) {
    %c0_i32 = arith.constant 0 : i32
    %c0_i32_0 = arith.constant 0 : i32
    %c0_i32_1 = arith.constant 0 : i32
    return %c0_i32, %c0_i32_0 : i32, i32
  }
  func.func @transform_6(%arg0: i32) -> (i32, i32) {
    %c0_i32 = arith.constant 0 : i32
    %c0_i32_0 = arith.constant 0 : i32
    %c0_i32_1 = arith.constant 0 : i32
    return %c0_i32, %c0_i32_0 : i32, i32
  }
  func.func @transform_7(%arg0: i32) -> (i32, i32) {
    %c0_i32 = arith.constant 0 : i32
    %c0_i32_0 = arith.constant 0 : i32
    %c0_i32_1 = arith.constant 0 : i32
    return %c0_i32, %c0_i32_0 : i32, i32
  }
  func.func @transform_8(%arg0: i32) -> (i32, i32) {
    %c0_i32 = arith.constant 0 : i32
    %c0_i32_0 = arith.constant 0 : i32
    %c0_i32_1 = arith.constant 0 : i32
    return %c0_i32, %c0_i32_0 : i32, i32
  }
  func.func @transform_9(%arg0: i32) -> (i32, i32) {
    %c0_i32 = arith.constant 0 : i32
    %c0_i32_0 = arith.constant 0 : i32
    return %c0_i32, %arg0 : i32, i32
  }
}

module attributes {stable_mosaic.version = 11 : i64} {
  func.func @segment_softmax_kernel(%arg0: i32, %arg1: i32, %arg2: memref<1x128xf32, #tpu.memory_space<vmem>>, %arg3: memref<1x128xi32, #tpu.memory_space<vmem>>, %arg4: memref<1x128xf32, #tpu.memory_space<vmem>>, %arg5: memref<8x1xf32, #tpu.memory_space<vmem>>, %arg6: memref<8x1xf32, #tpu.memory_space<vmem>>) attributes {dimension_semantics = [#tpu.dimension_semantics<arbitrary>, #tpu.dimension_semantics<arbitrary>], iteration_bounds = array<i64: 2, 1>, scalar_prefetch = 0 : i64, scratch_operands = 2 : i64, tpu.core_type = #tpu.core_type<tc>, window_params = [{transform_indices = @transform_0, window_bounds = array<i64: 1, 128>}, {transform_indices = @transform_1, window_bounds = array<i64: 1, 128>}, {transform_indices = @transform_2, window_bounds = array<i64: 1, 128>}]} {
    %c0_i32 = arith.constant 0 : i32
    %0 = arith.cmpi eq, %arg0, %c0_i32 : i32
    %c0_i32_0 = arith.constant 0 : i32
    %1 = arith.cmpi eq, %arg1, %c0_i32_0 : i32
    %2 = arith.andi %0, %1 : i1
    %3 = arith.extui %2 : i1 to i32
    %c0_i32_1 = arith.constant 0 : i32
    %4 = arith.cmpi ne, %3, %c0_i32_1 : i32
    scf.if %4 {
      %cst = arith.constant -1.000000e+30 : f32
      %16 = vector.broadcast %cst : f32 to vector<8x1xf32>
      %c0_8 = arith.constant 0 : index
      %c0_9 = arith.constant 0 : index
      %17 = vector.load %arg5[%c0_8, %c0_9] : memref<8x1xf32, #tpu.memory_space<vmem>>, vector<8x1xf32>
      tpu.vector_store %arg5[%c0_8, %c0_9], %16 {strides = array<i32>} : memref<8x1xf32, #tpu.memory_space<vmem>>, vector<8x1xf32>,
      %cst_10 = arith.constant 0.000000e+00 : f32
      %18 = vector.broadcast %cst_10 : f32 to vector<8x1xf32>
      %c0_11 = arith.constant 0 : index
      %c0_12 = arith.constant 0 : index
      %19 = vector.load %arg6[%c0_11, %c0_12] : memref<8x1xf32, #tpu.memory_space<vmem>>, vector<8x1xf32>
      tpu.vector_store %arg6[%c0_11, %c0_12], %18 {strides = array<i32>} : memref<8x1xf32, #tpu.memory_space<vmem>>, vector<8x1xf32>,
    } else {
    }
    %5 = tpu.iota {dimensions = array<i32: 0>} : vector<8x128xi32>
    %c0 = arith.constant 0 : index
    %c0_2 = arith.constant 0 : index
    %6 = vector.load %arg3[%c0, %c0_2] : memref<1x128xi32, #tpu.memory_space<vmem>>, vector<1x128xi32>
    %7 = vector.broadcast %6 : vector<1x128xi32> to vector<8x128xi32>
    %8 = arith.cmpi eq, %7, %5 : vector<8x128xi32>
    %c0_3 = arith.constant 0 : index
    %c0_4 = arith.constant 0 : index
    %9 = vector.load %arg2[%c0_3, %c0_4] : memref<1x128xf32, #tpu.memory_space<vmem>>, vector<1x128xf32>
    %c0_i32_5 = arith.constant 0 : i32
    %10 = arith.cmpi eq, %arg0, %c0_i32_5 : i32
    %11 = arith.extui %10 : i1 to i32
    %c0_i32_6 = arith.constant 0 : i32
    %12 = arith.cmpi ne, %11, %c0_i32_6 : i32
    scf.if %12 {
      %cst = arith.constant -1.000000e+30 : f32
      %16 = vector.shape_cast %9 : vector<1x128xf32> to vector<1x128xf32>
      %17 = vector.broadcast %16 : vector<1x128xf32> to vector<8x128xf32>
      %18 = vector.broadcast %cst : f32 to vector<8x128xf32>
      %19 = arith.select %8, %17, %18 : vector<8x128xi1>, vector<8x128xf32>
      %cst_8 = arith.constant dense<0xFF800000> : vector<8xf32>
      %20 = vector.multi_reduction <maximumf>, %19, %cst_8 [1] : vector<8x128xf32> to vector<8xf32>
      %21 = vector.shape_cast %20 : vector<8xf32> to vector<8x1xf32>
      %c0_9 = arith.constant 0 : index
      %c0_10 = arith.constant 0 : index
      %22 = vector.load %arg5[%c0_9, %c0_10] : memref<8x1xf32, #tpu.memory_space<vmem>>, vector<8x1xf32>
      %23 = arith.maximumf %22, %21 : vector<8x1xf32>
      %24 = vector.broadcast %23 : vector<8x1xf32> to vector<8x128xf32>
      %25 = arith.subf %19, %24 : vector<8x128xf32>
      %26 = math.exp %25 : vector<8x128xf32>
      %cst_11 = arith.constant 0.000000e+00 : f32
      %27 = vector.broadcast %cst_11 : f32 to vector<8x128xf32>
      %28 = arith.select %8, %26, %27 : vector<8x128xi1>, vector<8x128xf32>
      %c0_12 = arith.constant 0 : index
      %c0_13 = arith.constant 0 : index
      %29 = vector.load %arg6[%c0_12, %c0_13] : memref<8x1xf32, #tpu.memory_space<vmem>>, vector<8x1xf32>
      %30 = arith.subf %22, %23 : vector<8x1xf32>
      %31 = math.exp %30 : vector<8x1xf32>
      %32 = arith.mulf %29, %31 : vector<8x1xf32>
      %cst_14 = arith.constant dense<0.000000e+00> : vector<8xf32>
      %33 = vector.multi_reduction <add>, %28, %cst_14 [1] : vector<8x128xf32> to vector<8xf32>
      %34 = vector.shape_cast %33 : vector<8xf32> to vector<8x1xf32>
      %35 = arith.addf %32, %34 : vector<8x1xf32>
      %c0_15 = arith.constant 0 : index
      %c0_16 = arith.constant 0 : index
      %36 = vector.load %arg6[%c0_15, %c0_16] : memref<8x1xf32, #tpu.memory_space<vmem>>, vector<8x1xf32>
      tpu.vector_store %arg6[%c0_15, %c0_16], %35 {strides = array<i32>} : memref<8x1xf32, #tpu.memory_space<vmem>>, vector<8x1xf32>,
      %c0_17 = arith.constant 0 : index
      %c0_18 = arith.constant 0 : index
      %37 = vector.load %arg5[%c0_17, %c0_18] : memref<8x1xf32, #tpu.memory_space<vmem>>, vector<8x1xf32>
      tpu.vector_store %arg5[%c0_17, %c0_18], %23 {strides = array<i32>} : memref<8x1xf32, #tpu.memory_space<vmem>>, vector<8x1xf32>,
      %cst_19 = arith.constant 0.000000e+00 : f32
      %38 = vector.broadcast %cst_19 : f32 to vector<1x128xf32>
      %c0_20 = arith.constant 0 : index
      %c0_21 = arith.constant 0 : index
      %39 = vector.load %arg4[%c0_20, %c0_21] : memref<1x128xf32, #tpu.memory_space<vmem>>, vector<1x128xf32>
      tpu.vector_store %arg4[%c0_20, %c0_21], %38 {strides = array<i32>} : memref<1x128xf32, #tpu.memory_space<vmem>>, vector<1x128xf32>,
    } else {
    }
    %c1_i32 = arith.constant 1 : i32
    %13 = arith.cmpi eq, %arg0, %c1_i32 : i32
    %14 = arith.extui %13 : i1 to i32
    %c0_i32_7 = arith.constant 0 : i32
    %15 = arith.cmpi ne, %14, %c0_i32_7 : i32
    scf.if %15 {
      %16 = arith.extui %8 : vector<8x128xi1> to vector<8x128xi32>
      %17 = arith.sitofp %16 : vector<8x128xi32> to vector<8x128xf32>
      %c0_8 = arith.constant 0 : index
      %c0_9 = arith.constant 0 : index
      %18 = vector.load %arg5[%c0_8, %c0_9] : memref<8x1xf32, #tpu.memory_space<vmem>>, vector<8x1xf32>
      %19 = vector.broadcast %18 : vector<8x1xf32> to vector<8x128xf32>
      %20 = arith.mulf %17, %19 : vector<8x128xf32>
      %cst = arith.constant dense<0.000000e+00> : vector<128xf32>
      %21 = vector.multi_reduction <add>, %20, %cst [0] : vector<8x128xf32> to vector<128xf32>
      %22 = vector.shape_cast %21 : vector<128xf32> to vector<1x128xf32>
      %c0_10 = arith.constant 0 : index
      %c0_11 = arith.constant 0 : index
      %23 = vector.load %arg6[%c0_10, %c0_11] : memref<8x1xf32, #tpu.memory_space<vmem>>, vector<8x1xf32>
      %24 = vector.broadcast %23 : vector<8x1xf32> to vector<8x128xf32>
      %25 = arith.mulf %17, %24 : vector<8x128xf32>
      %cst_12 = arith.constant dense<0.000000e+00> : vector<128xf32>
      %26 = vector.multi_reduction <add>, %25, %cst_12 [0] : vector<8x128xf32> to vector<128xf32>
      %27 = vector.shape_cast %26 : vector<128xf32> to vector<1x128xf32>
      %28 = arith.subf %9, %22 : vector<1x128xf32>
      %29 = math.exp %28 : vector<1x128xf32>
      %cst_13 = arith.constant 1.000000e-16 : f32
      %30 = vector.broadcast %cst_13 : f32 to vector<1x128xf32>
      %31 = arith.addf %27, %30 : vector<1x128xf32>
      %32 = arith.divf %29, %31 : vector<1x128xf32>
      %c0_14 = arith.constant 0 : index
      %c0_15 = arith.constant 0 : index
      %33 = vector.load %arg4[%c0_14, %c0_15] : memref<1x128xf32, #tpu.memory_space<vmem>>, vector<1x128xf32>
      tpu.vector_store %arg4[%c0_14, %c0_15], %32 {strides = array<i32>} : memref<1x128xf32, #tpu.memory_space<vmem>>, vector<1x128xf32>,
    } else {
    }
    return
  }
  func.func @transform_0(%arg0: i32, %arg1: i32) -> (i32, i32) {
    %c0_i32 = arith.constant 0 : i32
    %c0_i32_0 = arith.constant 0 : i32
    return %c0_i32, %arg1 : i32, i32
  }
  func.func @transform_1(%arg0: i32, %arg1: i32) -> (i32, i32) {
    %c0_i32 = arith.constant 0 : i32
    %c0_i32_0 = arith.constant 0 : i32
    return %c0_i32, %arg1 : i32, i32
  }
  func.func @transform_2(%arg0: i32, %arg1: i32) -> (i32, i32) {
    %c0_i32 = arith.constant 0 : i32
    %c0_i32_0 = arith.constant 0 : i32
    return %c0_i32, %arg1 : i32, i32
  }
}

</mosaic_0001>

<bundles_post_ra>
// kernel: egat_att_forward.3
= control target key start
LH: loop header
LB: loop body
LE: loop exit
PB: predicated region body
PF: predicated region fallthrough
CT: control target
= control target key end

     0   :  { %s416_s9 = smov 0   ;;  %s418_s10 = smov 0   ;;  %s469_s0 = inlined_call_operand.vmem [shape: f32[1,128], index: 0, kind: input, shape index: {}]   ;;  %s470_s1 = inlined_call_operand.vmem [shape: s32[1,128], index: 1, kind: input, shape index: {}]   ;;  %s471_s2 = inlined_call_operand.vmem [shape: f32[1,128], index: 2, kind: output, shape index: {}]  }
   0x1   :  { %s420_s11 = smov 0  }
   0x2 LB: > { %s24_s12 = sadd.s32 1, %s389_s10  ;;  %p321_p0 = scmp.ge.s32.totalorder %s393_s11, 1  ;;  %s393_s11 = sphi %s420_s11, %s12_s11   ;;  %s389_s10 = sphi %s418_s10, %s473_s10   ;;  %s385_s9 = sphi %s416_s9, %s472_s9  }
   0x3   : > { %p26_p1 = scmp.ge.s32.totalorder %s24_s12, 2  ;;  %p130_p2 = scmp.lt.s32.totalorder %s393_s11, 3 }
   0x5   : > { %s475_s12 = smov (%p26_p1, %s24_s12), 0  ;;  %p131_p3 = pnand %p321_p0, %p130_p2 }
   0x6   : > { %p160_p4 = scmp.eq.s32.totalorder (!%p131_p3), %s385_s9, 0 }
   0x7   : > { %134 = sbr.rel (%p131_p3) target bundleno = 628 (0x274), region = 28 }
   0xe   : > { %165 = sbr.rel (!%p160_p4) target bundleno = 21 (0x15), region = 32  ;;  %vm166_vm0 = vcmask (%p160_p4), 7168   ;;  %v395_v0 = vmov (%p160_p4), -1e+30   ;;  %v396_v1 = vmov (%p160_p4), 0.0  }
   0xf   : > { %167 = vst.msk [vmem:[#allocation2] sm:$0xff] (%p160_p4), %vm166_vm0, %v395_v0  ;;  %168 = vst.msk [vmem:[#allocation3] sm:$0xff] (%p160_p4), %vm166_vm0, %v396_v1 }
  0x15 PF: > { %v169_v2 = vlaneseq  ;;  %v440_v3 = vld [vmem:[%s469_s0] sm:$0x1]  ;;  %p324_p5 = scmp.ne.s32.totalorder %s385_s9, 0 }
  0x16   : > { %v323_v4 = vld [vmem:[%s470_s1] ss:$0 sm:$0xff]  ;;  %v397_v9 = vmov (!%p324_p5), 0   ;;  %vm209_vm2 = vcmask (!%p324_p5), 7168   ;;  %v398_v19 = vmov (!%p324_p5), 0.0   ;;  %v201_v22 = vld [vmem:[#allocation3] sm:$0xff] (!%p324_p5) }
  0x17   : > { %v170_v5 = vshrl.u32 %v169_v2, 7  ;;  %180 = sbr.rel (%p324_p5) target bundleno = 463 (0x1cf), region = 36  ;;  %361 = vset.pattern.permute.xlu0 (!%p324_p5), %v397_v9  ;;  %v190_v10 = vld [vmem:[#allocation2] sm:$0xff] (!%p324_p5)  ;;  %212 = vst [vmem:[%s471_s2] sm:$0x1] (!%p324_p5), %v398_v19 }
  0x19   : > { %vm176_vm1 = vcmp.eq.s32.totalorder %v323_v4, %v170_v5  ;;  %v184_v6 = vsub.s32 (!%p324_p5), 0, %v170_v5 }
  0x1b   : > { %v185_v7 = vrot.slane (!%p324_p5), %v440_v3, %v184_v6 }
  0x1d   : > { %v187_v8 = vsel (!%p324_p5), %vm176_vm1, %v185_v7, -1e+30 }
  0x1e   : > { %188 = vmax.xlane.f32.xlu0 %v187_v8 }
  0xab   : > { %v189_v11 = vpop.xlane.xlu0 %188 }
  0xac   : > { %v191_v12 = vmax.f32 %v190_v10, %v189_v11 }
  0xae   : > { %v202_v13 = vsub.f32 %v190_v10, %v191_v12  ;;  %211 = vst.msk [vmem:[#allocation2] sm:$0xff] %vm209_vm2, %v191_v12  ;;  %194 = vperm.xlu0 %361, %v191_v12  }
  0xb0   : > { %v203_v20 = vmul.f32 1.442695, %v202_v13 }
 0x12d   : > { %v195_v14 = vpop.permute.xlu0 %194 }
 0x12e   : > { %v197_v15 = vsub.f32 %v187_v8, %v195_v14 }
 0x130   : > { %v198_v16 = vmul.f32 1.442695, %v197_v15 }
 0x132   : > { %362 = vpow2.f32 %v198_v16 }
 0x133   : > { %364 = vpow2.f32 %v203_v20 }
 0x13c   : > { %v363_v17 = vpop.eup %362 }
 0x13d   : > { %v200_v18 = vsel %vm176_vm1, %v363_v17, 0.0  ;;  %v365_v21 = vpop.eup %364 }
 0x13e   : > { %206 = vadd.xlane.f32.xlu1 %v200_v18  ;;  %v205_v23 = vmul.f32 %v365_v21, %v201_v22 }
 0x1cb   : > { %v207_v24 = vpop.xlane.xlu1 %206 }
 0x1cc   : > { %v208_v25 = vadd.f32 %v207_v24, %v205_v23 }
 0x1ce   : > { %210 = vst.msk [vmem:[#allocation3] sm:$0xff] %vm209_vm2, %v208_v25 }
 0x1cf PF: > { %p325_p6 = scmp.ne.s32.totalorder %s385_s9, 1 }
 0x1d0   : > { %v219_v26 = vld [vmem:[#allocation2] sm:$0xff] (!%p325_p6)  ;;  %v399_v27 = vmov (!%p325_p6), 0   ;;  %v400_v29 = vmov (!%p325_p6), 0.0  }
 0x1d1   : > { %216 = sbr.rel (%p325_p6) target bundleno = 628 (0x274), region = 40  ;;  %366 = vset.pattern.permute.xlu0 (!%p325_p6), %v399_v27  ;;  %v326_v30 = vsel (!%p325_p6), %vm176_vm1, 1.0, %v400_v29 }
 0x1d2   : > { %222 = vperm.xlu0 (!%p325_p6), %366, %v219_v26  }
 0x1d5   : > { %v232_v28 = vld [vmem:[#allocation3] sm:$0xff] (!%p325_p6) }
 0x1d6   : > { %235 = vperm.xlu0 (!%p325_p6), %366, %v232_v28  }
 0x251   : > { %v223_v31 = vpop.permute.xlu0 %222 }
 0x252   : > { %v225_v32 = vmul.f32 %v326_v30, %v223_v31 }
 0x254   : > { %v226_v33 = vrot.slane %v225_v32, 4 }
 0x255   : > { %v236_v34 = vpop.permute.xlu0 %235 }
 0x256   : > { %v227_v35 = vadd.f32 %v226_v33, %v225_v32  ;;  %v238_v36 = vmul.f32 %v326_v30, %v236_v34 }
 0x258   : > { %v228_v37 = vrot.slane %v227_v35, 2  ;;  %v239_v38 = vrot.slane %v238_v36, 4 }
 0x25a   : > { %v229_v39 = vadd.f32 %v228_v37, %v227_v35  ;;  %v240_v40 = vadd.f32 %v239_v38, %v238_v36 }
 0x25c   : > { %v230_v41 = vrot.slane %v229_v39, 1  ;;  %v241_v42 = vrot.slane %v240_v40, 2 }
 0x25e   : > { %v231_v43 = vadd.f32 %v230_v41, %v229_v39  ;;  %v242_v44 = vadd.f32 %v241_v42, %v240_v40 }
 0x260   : > { %v245_v45 = vsub.f32 %v440_v3, %v231_v43  ;;  %v243_v46 = vrot.slane %v242_v44, 1 }
 0x262   : > { %v246_v47 = vmul.f32 1.442695, %v245_v45  ;;  %v244_v48 = vadd.f32 %v243_v46, %v242_v44 }
 0x264   : > { %v248_v49 = vadd.f32 1e-16, %v244_v48  ;;  %367 = vpow2.f32 %v246_v47 }
 0x266   : > { %369 = vrcp.f32 %v248_v49 }
 0x26e   : > { %v368_v50 = vpop.eup %367 }
 0x270   : > { %v370_v51 = vpop.eup %369 }
 0x271   : > { %v250_v52 = vmul.f32 %v370_v51, %v368_v50 }
 0x273   : > { %251 = vst [vmem:[%s471_s2] sm:$0x1] %v250_v52 }
 0x274 PF: > { %s12_s11 = sadd.s32 1, %s393_s11   ;;  %s472_s9 = smov %s389_s10 }
 0x275   : > { %p9_p7 = scmp.ge.s32.totalorder %s12_s11, 4   ;;  %s473_s10 = smov %s475_s12 }
 0x277   :  { %11 = sbr.rel (!%p9_p7) target bundleno = 2 (0x2), region = 73 }

// kernel: egat_att_forward.2
= control target key start
LH: loop header
LB: loop body
LE: loop exit
PB: predicated region body
PF: predicated region fallthrough
CT: control target
= control target key end

     0   :  { %v696_v4 = vmov 0   ;;  %vm180_vm0 = vcmask 261120   ;;  %vm78_vm1 = vcmask 883712   ;;  %vm91_vm2 = vcmask 1043456   ;;  %s865_s1 = inlined_call_operand.vmem [shape: bf16[108,128], index: 1, kind: input, shape index: {}]   ;;  %s866_s0 = inlined_call_operand.vmem [shape: bf16[32,128], index: 0, kind: input, shape index: {}]   ;;  %s867_s8 = inlined_call_operand.<no memory space> [shape: f32[1,1], index: 8, kind: input, shape index: {}]   ;;  %s868_s2 = inlined_call_operand.vmem [shape: f32[32,32], index: 2, kind: input, shape index: {}]   ;;  %s869_s3 = inlined_call_operand.vmem [shape: f32[32,108], index: 3, kind: input, shape index: {}]   ;;  %s870_s4 = inlined_call_operand.vmem [shape: f32[32,1], index: 4, kind: input, shape index: {}]   ;;  %s871_s6 = inlined_call_operand.vmem [shape: f32[32,1], index: 6, kind: input, shape index: {}]   ;;  %s872_s7 = inlined_call_operand.vmem [shape: f32[32,1], index: 7, kind: input, shape index: {}]   ;;  %s873_s5 = inlined_call_operand.vmem [shape: f32[32,32], index: 5, kind: input, shape index: {}]   ;;  %s874_s9 = inlined_call_operand.vmem [shape: f32[1,128], index: 9, kind: output, shape index: {}]  }
   0x1   :  { %v514_v0 = vld [vmem:[%s865_s1] sm:$0xff]   ;;  %v538_v1 = vld [vmem:[%s865_s1 + $0x8] sm:$0xff]   ;;  %v14_v2 = vstv %s867_s8  ;;  %693 = vset.pattern.permute.xlu0 %v696_v4  ;;  %v539_v6 = vld [vmem:[%s865_s1 + $0x10] sm:$0xff]   ;;  %694 = vset.pattern.permute.xlu1 %v696_v4  ;;  %vm697_vm3 = vmmov 1  }
   0x2   :  { %640 = vmatprep.subr.bf16.mxu0 %v514_v0  ;;  %v506_v3 = vld [vmem:[%s866_s0] sm:$0xff]   ;;  %15 = vst [vmem:[#allocation2] sm:$0x1] %v14_v2  ;;  %v537_v5 = vld [vmem:[%s866_s0 + $0x8] sm:$0xff]   ;;  %v280_v11 = vld [vmem:[%s870_s4 + $0x10] sm:$0xff] }
   0x3   :  { %642 = vmatpush3.bf16.msra.mxu0 %v514_v0  ;;  %670 = vmatprep.subr.bf16.mxu1 %v506_v3  ;;  %v70_v7 = vld [vmem:[%s868_s2] sm:$0xff]  ;;  %v71_v10 = vld [vmem:[%s868_s2 + $0x8] sm:$0xff]  ;;  %v540_v12 = vld [vmem:[%s865_s1 + $0x18] sm:$0xff]  }
   0x4   :  { %644 = vmatprep.subr.bf16.mxu0 %v538_v1  ;;  %672 = vmatpush3.bf16.msra.mxu1 %v506_v3  ;;  %v74_v8 = vld [vmem:[%s869_s3] sm:$0xff]  ;;  %v72_v13 = vld [vmem:[%s868_s2 + $0x10] sm:$0xff]  ;;  %v279_v14 = vld [vmem:[%s870_s4 + $0x8] sm:$0xff] }
   0x5   :  { %674 = vmatprep.subr.bf16.mxu1 %v537_v5  ;;  %619 = vmatprep.mubr.msk.f32.mxu1 %vm180_vm0, %v70_v7  ;;  %v278_v9 = vld [vmem:[%s870_s4] sm:$0xff]  ;;  %v281_v15 = vld [vmem:[%s870_s4 + $0x18] sm:$0xff]  ;;  %v315_v19 = vld [vmem:[%s871_s6 + $0x8] sm:$0xff] }
   0x6   :  { %605 = vmatprep.mubr.msk.f32.mxu0 %vm78_vm1, %v74_v8  ;;  %284 = vperm.xlu0 %693, %v278_v9   ;;  %v73_v16 = vld [vmem:[%s868_s2 + $0x18] sm:$0xff]  ;;  %v541_v17 = vld [vmem:[%s865_s1 + $0x20] sm:$0xff]   ;;  %v542_v20 = vld [vmem:[%s865_s1 + $0x28] sm:$0xff]  }
   0x7   :  { %646 = vmatpush3.bf16.msra.mxu0 %v538_v1  ;;  %294 = vperm.xlu1 %694, %v280_v11   ;;  %v314_v18 = vld [vmem:[%s871_s6] sm:$0xff]  ;;  %v316_v21 = vld [vmem:[%s871_s6 + $0x10] sm:$0xff]  ;;  %v317_v22 = vld [vmem:[%s871_s6 + $0x18] sm:$0xff] }
   0x8   :  { %648 = vmatprep.subr.bf16.mxu0 %v539_v6  ;;  %676 = vmatpush3.bf16.msra.mxu1 %v537_v5  ;;  %v695_v23 = vld [vmem:[%s865_s1 + $0x30] sm:$0x3f]   ;;  %vm664_vm4 = vmpackc.low %vm91_vm2, %vm697_vm3  ;;  %v439_v24 = vld [vmem:[%s872_s7] sm:$0xff] }
   0x9   :  { %v440_v25 = vld [vmem:[%s872_s7 + $0x8] sm:$0xff]  ;;  %v441_v26 = vld [vmem:[%s872_s7 + $0x10] sm:$0xff]  ;;  %v442_v27 = vld [vmem:[%s872_s7 + $0x18] sm:$0xff] }
   0xa   :  { %289 = vperm.xlu0 %693, %v279_v14   ;;  %v75_v28 = vld [vmem:[%s869_s3 + $0x8] sm:$0xff]  ;;  %v76_v29 = vld [vmem:[%s869_s3 + $0x10] sm:$0xff]  ;;  %v476_v30 = vld [vmem:[#allocation2] sm:$0x1] }
   0xb   :  { %650 = vmatpush3.bf16.msra.mxu0 %v539_v6  ;;  %620 = vmatmul.mubr.msk.f32.vlgmr.msra.gmra.mrb[0].mxu1 %vm180_vm0, %v71_v10  ;;  %v77_v31 = vld [vmem:[%s869_s3 + $0x18] sm:$0xff]  ;;  %v310_v32 = vld [vmem:[%s873_s5] sm:$0xff]  ;;  %v311_v59 = vld [vmem:[%s873_s5 + $0x8] sm:$0xff] }
   0xc   :  { %652 = vmatprep.subr.bf16.mxu0 %v540_v12  ;;  %622 = vmatprep.mubr.msk.f32.mxu1 %vm180_vm0, %v72_v13  ;;  %v312_v60 = vld [vmem:[%s873_s5 + $0x10] sm:$0xff]  ;;  %v313_v61 = vld [vmem:[%s873_s5 + $0x18] sm:$0xff] }
   0xd   :  { %299 = vperm.xlu1 %694, %v281_v15  }
   0xe   :  { %320 = vperm.xlu0 %693, %v314_v18  }
   0xf   :  { %654 = vmatpush3.bf16.msra.mxu0 %v540_v12  ;;  %623 = vmatmul.mubr.msk.f32.gmra.mrb[2].mxu1 %vm180_vm0, %v73_v16 }
  0x10   :  { %656 = vmatprep.subr.bf16.mxu0 %v541_v17  ;;  %633 = vmatprep.mubr.msk.f32.mxu1 %vm180_vm0, %v310_v32 }
  0x11   :  { %325 = vperm.xlu1 %694, %v315_v19  }
  0x12   :  { %330 = vperm.xlu0 %693, %v316_v21  }
  0x13   :  { %658 = vmatpush3.bf16.msra.mxu0 %v541_v17 }
  0x14   :  { %660 = vmatprep.subr.bf16.mxu0 %v542_v20 }
  0x15   :  { %335 = vperm.xlu1 %694, %v317_v22  }
  0x16   :  { %445 = vperm.xlu0 %693, %v439_v24   ;;  %v482_v24 = vlaneseq }
  0x17   :  { %662 = vmatpush3.bf16.msra.mxu0 %v542_v20 }
  0x18   :  { %665 = vmatprep.subr.msk.bf16.mxu0 %vm664_vm4, %v695_v23 }
  0x19   :  { %450 = vperm.xlu1 %694, %v440_v25  }
  0x1a   :  { %455 = vperm.xlu0 %693, %v441_v26  }
  0x1b   :  { %668 = vmatpush3.bf16.msk.msra.mxu0 %vm664_vm4, %v695_v23 }
  0x1d   :  { %460 = vperm.xlu1 %694, %v442_v27   ;;  %v483_v27 = vshrl.u32 %v482_v24, 7 }
  0x1e   :  { %606 = vmatmul.mubr.msk.f32.vlgmr.msra.gmra.mrb[0].mxu0 %vm78_vm1, %v75_v28  ;;  %479 = vperm.xlu0 %693, %v476_v30  }
  0x1f   :  { %608 = vmatprep.mubr.msk.f32.mxu0 %vm78_vm1, %v76_v29  ;;  %v484_v30 = vsub.s32 0, %v483_v27 }
  0x22   :  { %609 = vmatmul.mubr.msk.f32.gmra.mrb[2].mxu0 %vm78_vm1, %v77_v31 }
  0x85   :  { %v285_v37 = vpop.permute.xlu0 %284 }
  0x86   :  { %v295_v38 = vpop.permute.xlu1 %294 }
  0x89   :  { %v290_v42 = vpop.permute.xlu0 %289 }
  0x8c   :  { %v300_v50 = vpop.permute.xlu1 %299 }
  0x8d   :  { %v321_v62 = vpop.permute.xlu0 %320 }
  0x90   :  { %v326_v63 = vpop.permute.xlu1 %325 }
  0x91   :  { %v331_v0 = vpop.permute.xlu0 %330 }
  0x94   :  { %v336_v1 = vpop.permute.xlu1 %335 }
  0x95   :  { %v446_v6 = vpop.permute.xlu0 %445 }
  0x98   :  { %v451_v8 = vpop.permute.xlu1 %450 }
  0x99   :  { %v456_v19 = vpop.permute.xlu0 %455 }
  0x9c   :  { %v461_v21 = vpop.permute.xlu1 %460 }
  0x9d   :  { %v480_v32 = vpop.permute.xlu0 %479 }
  0xde   :  { %v621_v33 = vpop.f32.mrb[0].mxu1 }
  0xdf   :  { %v259_v34 = vpop.f32.mrb[1].mxu1 }
  0xe2   :  { %v624_v35 = vpop.f32.mrb[2].mxu1 }
  0xe3   :  { %v269_v36 = vpop.f32.mrb[3].mxu1 }
  0xf1   :  { %v607_v39 = vpop.f32.mrb[0].mxu0 }
  0xf2   :  { %v265_v40 = vadd.f32 %v621_v33, %v607_v39  ;;  %v161_v41 = vpop.f32.mrb[1].mxu0 }
  0xf3   :  { %v260_v43 = vadd.f32 %v259_v34, %v161_v41  ;;  %v485_v34 = vrot.slane %v480_v32, %v484_v30 }
  0xf4   :  { %v303_v44 = vadd.f32 %v290_v42, %v265_v40 }
  0xf5   :  { %v302_v45 = vadd.f32 %v285_v37, %v260_v43  ;;  %v610_v46 = vpop.f32.mrb[2].mxu0 }
  0xf6   :  { %v307_v47 = vmax.f32 %v303_v44, 0.0  ;;  %v275_v48 = vadd.f32 %v624_v35, %v610_v46  ;;  %v171_v49 = vpop.f32.mrb[3].mxu0 }
  0xf7   :  { %v306_v51 = vmax.f32 %v302_v45, 0.0  ;;  %v270_v52 = vadd.f32 %v269_v36, %v171_v49 }
  0xf8   :  { %v305_v53 = vadd.f32 %v300_v50, %v275_v48 }
  0xf9   :  { %v304_v54 = vadd.f32 %v295_v38, %v270_v52  ;;  %v677_v55 = vpack.c.bf16 %v307_v47, %v306_v51 }
  0xfa   :  { %v309_v56 = vmax.f32 %v305_v53, 0.0 }
  0xfb   :  { %v308_v57 = vmax.f32 %v304_v54, 0.0  ;;  %678 = vmatprep.subr.bf16.mxu1 %v677_v55 }
  0xfc   :  { %680 = vmatpush3.bf16.msra.mxu1 %v677_v55 }
  0xfd   :  { %v681_v58 = vpack.c.bf16 %v309_v56, %v308_v57 }
  0xff   :  { %682 = vmatprep.subr.bf16.mxu1 %v681_v58 }
 0x100   :  { %684 = vmatpush3.bf16.msra.mxu1 %v681_v58 }
 0x103   :  { %634 = vmatmul.mubr.msk.f32.vlgmr.msra.gmra.mrb[4].mxu1 %vm180_vm0, %v311_v59 }
 0x104   :  { %636 = vmatprep.mubr.msk.f32.mxu1 %vm180_vm0, %v312_v60 }
 0x107   :  { %637 = vmatmul.mubr.msk.f32.gmra.mrb[6].mxu1 %vm180_vm0, %v313_v61 }
 0x1d6   :  { %v635_v2 = vpop.f32.mrb[4].mxu1 }
 0x1d7   :  { %v422_v3 = vadd.f32 %v635_v2, %v326_v63  ;;  %v416_v4 = vpop.f32.mrb[5].mxu1 }
 0x1d8   :  { %v417_v5 = vadd.f32 %v416_v4, %v321_v62 }
 0x1d9   :  { %v436_v7 = vmax.f32 %v422_v3, 0.0 }
 0x1da   :  { %v435_v9 = vmax.f32 %v417_v5, 0.0  ;;  %v638_v10 = vpop.f32.mrb[6].mxu1 }
 0x1db   :  { %v464_v11 = vmul.f32 %v451_v8, %v436_v7  ;;  %v432_v12 = vadd.f32 %v638_v10, %v336_v1  ;;  %v426_v13 = vpop.f32.mrb[7].mxu1 }
 0x1dc   :  { %v463_v14 = vmul.f32 %v446_v6, %v435_v9  ;;  %v427_v15 = vadd.f32 %v426_v13, %v331_v0 }
 0x1dd   :  { %v438_v17 = vmax.f32 %v432_v12, 0.0 }
 0x1de   :  { %v467_v16 = vadd.f32 %v464_v11, %v463_v14  ;;  %v437_v18 = vmax.f32 %v427_v15, 0.0 }
 0x1df   :  { %v466_v22 = vmul.f32 %v461_v21, %v438_v17 }
 0x1e0   :  { %v465_v20 = vmul.f32 %v456_v19, %v437_v18 }
 0x1e2   :  { %v468_v23 = vadd.f32 %v467_v16, %v465_v20 }
 0x1e4   :  { %v469_v25 = vadd.f32 %v468_v23, %v466_v22 }
 0x1e6   :  { %v470_v26 = vrot.slane %v469_v25, 4 }
 0x1e8   :  { %v471_v28 = vadd.f32 %v470_v26, %v469_v25 }
 0x1ea   :  { %v472_v29 = vrot.slane %v471_v28, 2 }
 0x1ec   :  { %v473_v31 = vadd.f32 %v472_v29, %v471_v28 }
 0x1ee   :  { %v474_v33 = vrot.slane %v473_v31, 1 }
 0x1f0   :  { %v475_v35 = vadd.f32 %v474_v33, %v473_v31 }
 0x1f2   :  { %v486_v36 = vadd.f32 %v485_v34, %v475_v35 }
 0x1f4   :  { %487 = vst [vmem:[%s874_s9] sm:$0x1] %v486_v36 }

</bundles_post_ra>
